<compile_context>
chip_gen: v7x
topology: tpu7x:2x2x1
jax: 0.10.0
libtpu: 0.0.40
codegen_flags: <defaults>
</compile_context>

<pallas_src>
import jax
import jax.numpy as jnp
from jax.experimental import pallas as pl
from jax.experimental.pallas import tpu as pltpu

_LANE = 128


def _sublane_quantum(dtype):
    # second-minor tiling quantum: 8 rows for 4-byte dtypes, 16 for 2-byte.
    return 16 if jnp.dtype(dtype).itemsize == 2 else 8


def _vmem_capacity_bytes():
    try:
        return int(pltpu.get_tpu_info().vmem_capacity_bytes)
    except Exception:
        return 64 * 2 ** 20  # conservative (v7x per-TC) fallback


def _default_tile_targets():
    # Bigger tiles on 128-MiB-VMEM parts (v5e/v6e) amortize per-step overhead
    # and halve halo-DMA waste; keep 256/256 on 64-MiB v7x.
    big = _vmem_capacity_bytes() >= 100 * 2 ** 20
    return (512, 512) if big else (256, 256)


def _pick_time_tile(T, quantum, target):
    """Largest multiple of `quantum` that divides T and is <= target (else T)."""
    if T <= target:
        return T
    t = (target // quantum) * quantum
    while t >= quantum:
        if T % t == 0:
            return t
        t -= quantum
    return T


def _pick_channel_tile(C, target):
    """Largest multiple of 128 that divides C and is <= target (else full C)."""
    if C <= target or C % _LANE != 0:
        return C
    t = (target // _LANE) * _LANE
    while t >= _LANE:
        if C % t == 0:
            return t
        t -= _LANE
    return C


def prepare_glu_params(weight, bias, *, channel_tile, compute_dtype=None):
    """One-time parameter transform (hoist out of the per-step forward path).

    weight: (2C, C, K) torch Conv1d layout -> (K, C, 2C) tap-major, with the
    output channels re-ordered so channel-tile j holds [filt_j | gate_j]
    adjacently.  bias is interleaved the same way and kept in f32.
    """
    out2, C, K = weight.shape
    assert out2 == 2 * C and K == 3, "GLUBlock kernel assumes k=3, pad=1, stride=1"
    TN = channel_tile
    assert C % TN == 0
    n_ct = C // TN

    w = jnp.transpose(weight, (2, 1, 0))                      # (K, C, 2C)
    w_f = w[:, :, :C].reshape(K, C, n_ct, TN)                 # filter half
    w_g = w[:, :, C:].reshape(K, C, n_ct, TN)                 # gate half
    w_i = jnp.concatenate([w_f, w_g], axis=-1).reshape(K, C, 2 * C)

    b_f = bias[:C].reshape(n_ct, TN)
    b_g = bias[C:].reshape(n_ct, TN)
    b_i = jnp.concatenate([b_f, b_g], axis=-1).reshape(1, 2 * C)

    if compute_dtype is not None:
        w_i = w_i.astype(compute_dtype)
    b_i = b_i.astype(jnp.float32)                             # bias added in f32
    return w_i, b_i


def _make_glu_kernel(*, TT, TN, C, H, Q, halo, fuse_taps):
    def _conv_glu(xm, prev_row, next_row, xpad_ref, w_ref, b_ref, o_ref):
        # Assemble the halo-padded (1 row each side) window in the COMPUTE
        # dtype: no f32 round trip, no casts.  Base write is sublane-aligned
        # (Q == compute-dtype quantum, TT a multiple of it for tiled shapes).
        xpad_ref[Q:Q + TT, :] = xm
        xpad_ref[Q - 1:Q, :] = prev_row
        xpad_ref[Q + TT:Q + TT + 1, :] = next_row
        x_prev = xpad_ref[Q - 1:Q - 1 + TT, :]
        x_next = xpad_ref[Q + 1:Q + 1 + TT, :]
        if fuse_taps:
            # Small C: one (TT, 3C) @ (3C, 2*TN) matmul -> 3x MXU K-occupancy
            # and a single push/drain instead of three.
            x3 = jnp.concatenate([x_prev, xm, x_next], axis=-1)
            w3 = w_ref[...].reshape(3 * C, 2 * TN)
            acc = jnp.dot(x3, w3, preferred_element_type=jnp.float32)
        else:
            # conv1d(k=3, pad=1) == sum of 3 shifted matmuls (f32 accumulation).
            acc = jnp.dot(xm, w_ref[1], preferred_element_type=jnp.float32)
            acc = acc + jnp.dot(x_prev, w_ref[0], preferred_element_type=jnp.float32)
            acc = acc + jnp.dot(x_next, w_ref[2], preferred_element_type=jnp.float32)
        acc = acc + b_ref[...]                       # single broadcast row-add
        # Interleaved layout => tile-local GLU split (filter * sigmoid(gate)).
        out = acc[:, :TN] * jax.nn.sigmoid(acc[:, TN:])
        o_ref[0] = out.astype(o_ref.dtype)

    if halo:
        def kernel(x_ref, xp_ref, xn_ref, w_ref, b_ref, o_ref, xpad_ref):
            i = pl.program_id(2)
            n_t = pl.num_programs(2)
            xm = x_ref[0]
            zero = jnp.zeros((1, C), xm.dtype)
            # slice the single needed halo row straight from the ref
            prev_row = jnp.where(i > 0, xp_ref[0, H - 1:H, :], zero)
            next_row = jnp.where(i < n_t - 1, xn_ref[0, 0:1, :], zero)
            _conv_glu(xm, prev_row, next_row, xpad_ref, w_ref, b_ref, o_ref)
    else:
        def kernel(x_ref, w_ref, b_ref, o_ref, xpad_ref):
            xm = x_ref[0]
            zero = jnp.zeros((1, C), xm.dtype)
            _conv_glu(xm, zero, zero, xpad_ref, w_ref, b_ref, o_ref)

    return kernel


def glu_block_prepared(x, w_i, b_i, *, channel_tile, out_dtype=None,
                       time_tile_target=None, fuse_taps=None):
    """GLUBlock forward given pre-transformed parameters (see prepare_glu_params)."""
    B, T, C = x.shape
    K = w_i.shape[0]
    assert K == 3 and w_i.shape == (K, C, 2 * C)
    TN = channel_tile
    assert C % TN == 0
    n_ct = C // TN
    out_dtype = x.dtype if out_dtype is None else out_dtype

    cdt = x.dtype
    if w_i.dtype != cdt:                       # matmul operands share one dtype
        w_i = w_i.astype(cdt)
    if fuse_taps is None:
        fuse_taps = C <= 128
    if time_tile_target is None:
        time_tile_target, _ = _default_tile_targets()

    quantum = _sublane_quantum(cdt)
    Q = quantum                                # scratch offset == cdt quantum
    T_orig = T
    TT = _pick_time_tile(T, quantum, time_tile_target)
    if TT == T and T > time_tile_target:
        # No clean divisor <= target: zero-pad T to a multiple of the target
        # tile (zero rows == the conv's own zero padding); surplus rows are
        # sliced off after the call.  Keeps the pipeline deep and VMEM bounded.
        TT = max(quantum, (time_tile_target // quantum) * quantum)
        pad_t = (-T) % TT
        x = jnp.pad(x, ((0, 0), (0, pad_t), (0, 0)))
        T = T + pad_t
    n_tt = T // TT
    halo = n_tt > 1
    H = quantum                                # halo-block row count
    tpb = TT // H if halo else 1               # halo-block units per time tile
    nb = T // H if halo else 1                 # halo blocks along T

    # --- block specs: grid = (channel tiles, batch, time tiles) -------------
    # Channel-tile axis OUTERMOST so the weight (index depends only on j) is
    # fetched n_ct times total, not B * n_ct times.
    in_specs = [pl.BlockSpec((1, TT, C), lambda j, b, i: (b, i, 0))]
    args = [x]
    if halo:
        in_specs.append(pl.BlockSpec(
            (1, H, C), lambda j, b, i: (b, jnp.maximum(i * tpb - 1, 0), 0)))
        in_specs.append(pl.BlockSpec(
            (1, H, C), lambda j, b, i: (b, jnp.minimum((i + 1) * tpb, nb - 1), 0)))
        args += [x, x]
    # weight/bias: constant block index along both inner axes -> single-buffer.
    in_specs.append(pl.BlockSpec((K, C, 2 * TN), lambda j, b, i: (0, 0, j),
                                 pipeline_mode=pl.Buffered(1)))
    in_specs.append(pl.BlockSpec((1, 2 * TN), lambda j, b, i: (0, j),
                                 pipeline_mode=pl.Buffered(1)))
    args += [w_i, b_i]
    out_spec = pl.BlockSpec((1, TT, TN), lambda j, b, i: (b, i, j))

    # --- explicit VMEM budget, derived from the actual part's capacity ------
    esz = jnp.dtype(cdt).itemsize
    oesz = jnp.dtype(out_dtype).itemsize
    est = 2 * TT * C * esz                     # x tile, double-buffered
    if halo:
        est += 2 * 2 * H * C * esz             # halo blocks, double-buffered
    est += K * C * 2 * TN * esz                # weight, single-buffered
    est += 2 * TN * 4                          # bias (f32), single-buffered
    est += 2 * TT * TN * oesz                  # out tile, double-buffered
    est += (TT + 2 * Q) * C * esz              # cdt padded-window scratch
    est += TT * 2 * TN * 4 + 2 * TT * C * esz  # f32 acc + shifted-operand temps
    phys = _vmem_capacity_bytes()
    hard_cap = (phys * 7) // 8                 # ~12% headroom for compiler scratch
    vmem_limit = int(min(hard_cap, max(32 * 2 ** 20, 2 * est)))

    kernel = _make_glu_kernel(TT=TT, TN=TN, C=C, H=H, Q=Q, halo=halo,
                              fuse_taps=fuse_taps)

    out = pl.pallas_call(
        kernel,
        out_shape=jax.ShapeDtypeStruct((B, T, C), out_dtype),
        grid_spec=pltpu.PrefetchScalarGridSpec(
            num_scalar_prefetch=0,
            grid=(n_ct, B, n_tt),
            in_specs=in_specs,
            out_specs=out_spec,
            scratch_shapes=[pltpu.VMEM((TT + 2 * Q, C), cdt)],
        ),
        compiler_params=pltpu.CompilerParams(
            dimension_semantics=("parallel", "parallel", "parallel"),
            vmem_limit_bytes=vmem_limit,
        ),
    )(*args)
    if T != T_orig:
        out = out[:, :T_orig, :]
    return out


def glu_block(x, weight, bias, *, compute_dtype=None,
              time_tile_target=None, channel_tile_target=None):
    """GLUBlock forward.

    x:      (B, T, C) channel-last input
    weight: (2C, C, 3) torch Conv1d weight layout
    bias:   (2C,)
    compute_dtype: optional MXU operand dtype (e.g. jnp.bfloat16); accumulation,
    bias and gating stay f32, output keeps x's original dtype.

    NOTE: in a real model, call prepare_glu_params once at init and use
    glu_block_prepared directly (the parameter reshuffle is hoistable).
    """
    B, T, C = x.shape
    assert weight.shape == (2 * C, C, 3) and bias.shape == (2 * C,)
    out_dtype = x.dtype
    if compute_dtype is not None and x.dtype != compute_dtype:
        x = x.astype(compute_dtype)
    if channel_tile_target is None:
        _, channel_tile_target = _default_tile_targets()
    TN = _pick_channel_tile(C, channel_tile_target)
    w_i, b_i = prepare_glu_params(weight, bias, channel_tile=TN,
                                  compute_dtype=x.dtype)
    return glu_block_prepared(x, w_i, b_i, channel_tile=TN, out_dtype=out_dtype,
                              time_tile_target=time_tile_target)


def glu_block_ref(x, weight, bias):
    """Pure-JAX reference (mirrors the PyTorch forward exactly)."""
    x_nct = jnp.transpose(x, (0, 2, 1))
    conv = jax.lax.conv_general_dilated(
        x_nct, weight, window_strides=(1,), padding=((1, 1),),
        dimension_numbers=("NCH", "OIH", "NCH"),
        precision=jax.lax.Precision.HIGHEST,
    ) + bias[None, :, None]
    C = x.shape[-1]
    filt, gate = conv[:, :C, :], conv[:, C:, :]
    return jnp.transpose(filt * jax.nn.sigmoid(gate), (0, 2, 1))


if __name__ == "__main__":
    def make_inputs(key, B, T, C, K=3):
        kx, kw, kb = jax.random.split(key, 3)
        x = jax.random.normal(kx, (B, T, C), dtype=jnp.float32)
        bound = 1.0 / ((C * K) ** 0.5)
        weight = jax.random.uniform(kw, (2 * C, C, K), jnp.float32, -bound, bound)
        bias = jax.random.uniform(kb, (2 * C,), jnp.float32, -bound, bound)
        return x, weight, bias

    k1, k2, k3, k4 = jax.random.split(jax.random.PRNGKey(0), 4)

    # 1) nominal small config: single tile, fused-tap (K=3C) path.
    x, w, b = make_inputs(k1, B=2, T=8, C=32)
    out = jax.block_until_ready(glu_block(x, w, b))
    ref = glu_block_ref(x, w, b)
    assert out.shape == (2, 8, 32)
    err = float(jnp.max(jnp.abs(out - ref)))
    assert jnp.allclose(out, ref, atol=5e-3, rtol=5e-3), err

    # 2) time tiling (halo path) + output-channel tiling, f32, 3-matmul path.
    x, w, b = make_inputs(k2, B=2, T=64, C=256)
    out = jax.block_until_ready(
        glu_block(x, w, b, time_tile_target=16, channel_tile_target=128))
    ref = glu_block_ref(x, w, b)
    err = float(jnp.max(jnp.abs(out - ref)))
    assert jnp.allclose(out, ref, atol=5e-3, rtol=5e-3), err

    # 3) bf16 MXU operands with f32 accumulation / gating (loose tolerance).
    x, w, b = make_inputs(k3, B=2, T=64, C=256)
    out = jax.block_until_ready(
        glu_block(x, w, b, compute_dtype=jnp.bfloat16,
                  time_tile_target=32, channel_tile_target=128))
    ref = glu_block_ref(x, w, b)
    assert out.dtype == x.dtype
    err = float(jnp.max(jnp.abs(out.astype(jnp.float32) - ref)))
    assert jnp.allclose(out.astype(jnp.float32), ref, atol=1e-1, rtol=5e-2), err

    # 4) non-divisible T: pad-to-tile path (no full-T fallback).
    x, w, b = make_inputs(k4, B=2, T=52, C=128)
    out = jax.block_until_ready(glu_block(x, w, b, time_tile_target=16))
    ref = glu_block_ref(x, w, b)
    assert out.shape == (2, 52, 128)
    err = float(jnp.max(jnp.abs(out - ref)))
    assert jnp.allclose(out, ref, atol=5e-3, rtol=5e-3), err

    print("KERNEL_OK")
</pallas_src>

<mosaic_0001>
module attributes {stable_mosaic.version = 11 : i64} {
  func.func @kernel(%arg0: i32, %arg1: i32, %arg2: i32, %arg3: memref<1x8x32xf32, #tpu.memory_space<vmem>>, %arg4: memref<3x32x64xf32, #tpu.memory_space<vmem>>, %arg5: memref<1x64xf32, #tpu.memory_space<vmem>>, %arg6: memref<1x8x32xf32, #tpu.memory_space<vmem>>, %arg7: memref<24x32xf32, #tpu.memory_space<vmem>>) attributes {dimension_semantics = [#tpu.dimension_semantics<parallel>, #tpu.dimension_semantics<parallel>, #tpu.dimension_semantics<parallel>], iteration_bounds = array<i64: 1, 2, 1>, scalar_prefetch = 0 : i64, scratch_operands = 1 : i64, tpu.core_type = #tpu.core_type<tc>, window_params = [{transform_indices = @transform_0, window_bounds = array<i64: 1, 8, 32>}, {pipeline_mode = #tpu.pipeline_mode<synchronous>, transform_indices = @transform_1, window_bounds = array<i64: 3, 32, 64>}, {pipeline_mode = #tpu.pipeline_mode<synchronous>, transform_indices = @transform_2, window_bounds = array<i64: 1, 64>}, {transform_indices = @transform_3, window_bounds = array<i64: 1, 8, 32>}]} {
    %c0 = arith.constant 0 : index
    %c0_0 = arith.constant 0 : index
    %c0_1 = arith.constant 0 : index
    %0 = vector.load %arg3[%c0, %c0_0, %c0_1] : memref<1x8x32xf32, #tpu.memory_space<vmem>>, vector<1x8x32xf32>
    %1 = vector.shape_cast %0 : vector<1x8x32xf32> to vector<8x32xf32>
    %cst = arith.constant 0.000000e+00 : f32
    %2 = vector.broadcast %cst : f32 to vector<1x32xf32>
    %c8 = arith.constant 8 : index
    %c0_2 = arith.constant 0 : index
    %3 = vector.load %arg7[%c8, %c0_2] : memref<24x32xf32, #tpu.memory_space<vmem>>, vector<8x32xf32>
    tpu.vector_store %arg7[%c8, %c0_2], %1 {strides = array<i32>} : memref<24x32xf32, #tpu.memory_space<vmem>>, vector<8x32xf32>,
    %c7 = arith.constant 7 : index
    %c0_3 = arith.constant 0 : index
    %4 = vector.load %arg7[%c7, %c0_3] : memref<24x32xf32, #tpu.memory_space<vmem>>, vector<1x32xf32>
    tpu.vector_store %arg7[%c7, %c0_3], %2 {strides = array<i32>} : memref<24x32xf32, #tpu.memory_space<vmem>>, vector<1x32xf32>,
    %c16 = arith.constant 16 : index
    %c0_4 = arith.constant 0 : index
    %5 = vector.load %arg7[%c16, %c0_4] : memref<24x32xf32, #tpu.memory_space<vmem>>, vector<1x32xf32>
    tpu.vector_store %arg7[%c16, %c0_4], %2 {strides = array<i32>} : memref<24x32xf32, #tpu.memory_space<vmem>>, vector<1x32xf32>,
    %c7_5 = arith.constant 7 : index
    %c0_6 = arith.constant 0 : index
    %6 = vector.load %arg7[%c7_5, %c0_6] : memref<24x32xf32, #tpu.memory_space<vmem>>, vector<8x32xf32>
    %c9 = arith.constant 9 : index
    %c0_7 = arith.constant 0 : index
    %7 = vector.load %arg7[%c9, %c0_7] : memref<24x32xf32, #tpu.memory_space<vmem>>, vector<8x32xf32>
    %8 = tpu.concatenate %6, %1, %7 in 1 : vector<8x32xf32>, vector<8x32xf32>, vector<8x32xf32> -> vector<8x96xf32>
    %c0_8 = arith.constant 0 : index
    %c0_9 = arith.constant 0 : index
    %c0_10 = arith.constant 0 : index
    %9 = vector.load %arg4[%c0_8, %c0_9, %c0_10] : memref<3x32x64xf32, #tpu.memory_space<vmem>>, vector<3x32x64xf32>
    %10 = vector.shape_cast %9 : vector<3x32x64xf32> to vector<96x64xf32>
    %cst_11 = arith.constant dense<0.000000e+00> : vector<8x64xf32>
    %11 = tpu.matmul %8, %10, %cst_11 {dimension_numbers = #tpu.dot_dimension_numbers<[1], [0], [0], [1], [0, 0, 1, 1], [], []>} : vector<8x96xf32>, vector<96x64xf32>, vector<8x64xf32> -> vector<8x64xf32>
    %c0_12 = arith.constant 0 : index
    %c0_13 = arith.constant 0 : index
    %12 = vector.load %arg5[%c0_12, %c0_13] : memref<1x64xf32, #tpu.memory_space<vmem>>, vector<1x64xf32>
    %13 = vector.broadcast %12 : vector<1x64xf32> to vector<8x64xf32>
    %14 = arith.addf %11, %13 : vector<8x64xf32>
    %15 = vector.extract_strided_slice %14 {offsets = [0, 0], sizes = [8, 32], strides = [1, 1]} : vector<8x64xf32> to vector<8x32xf32>
    %16 = vector.extract_strided_slice %14 {offsets = [0, 32], sizes = [8, 32], strides = [1, 1]} : vector<8x64xf32> to vector<8x32xf32>
    %17 = arith.negf %16 : vector<8x32xf32>
    %18 = math.exp %17 : vector<8x32xf32>
    %cst_14 = arith.constant 1.000000e+00 : f32
    %19 = vector.broadcast %cst_14 : f32 to vector<8x32xf32>
    %20 = arith.addf %19, %18 : vector<8x32xf32>
    %21 = arith.divf %19, %20 : vector<8x32xf32>
    %22 = arith.mulf %15, %21 : vector<8x32xf32>
    %c0_15 = arith.constant 0 : index
    %c0_16 = arith.constant 0 : index
    %c0_17 = arith.constant 0 : index
    %23 = vector.load %arg6[%c0_15, %c0_16, %c0_17] : memref<1x8x32xf32, #tpu.memory_space<vmem>>, vector<1x8x32xf32>
    %24 = vector.shape_cast %23 : vector<1x8x32xf32> to vector<8x32xf32>
    %25 = vector.shape_cast %22 : vector<8x32xf32> to vector<1x8x32xf32>
    tpu.vector_store %arg6[%c0_15, %c0_16, %c0_17], %25 {strides = array<i32>} : memref<1x8x32xf32, #tpu.memory_space<vmem>>, vector<1x8x32xf32>,
    return
  }
  func.func @transform_0(%arg0: i32, %arg1: i32, %arg2: i32) -> (i32, i32, i32) {
    %c0_i32 = arith.constant 0 : i32
    %c0_i32_0 = arith.constant 0 : i32
    return %arg1, %arg2, %c0_i32 : i32, i32, i32
  }
  func.func @transform_1(%arg0: i32, %arg1: i32, %arg2: i32) -> (i32, i32, i32) {
    %c0_i32 = arith.constant 0 : i32
    %c0_i32_0 = arith.constant 0 : i32
    %c0_i32_1 = arith.constant 0 : i32
    return %c0_i32, %c0_i32_0, %arg0 : i32, i32, i32
  }
  func.func @transform_2(%arg0: i32, %arg1: i32, %arg2: i32) -> (i32, i32) {
    %c0_i32 = arith.constant 0 : i32
    %c0_i32_0 = arith.constant 0 : i32
    return %c0_i32, %arg0 : i32, i32
  }
  func.func @transform_3(%arg0: i32, %arg1: i32, %arg2: i32) -> (i32, i32, i32) {
    %c0_i32 = arith.constant 0 : i32
    return %arg1, %arg2, %arg0 : i32, i32, i32
  }
}

</mosaic_0001>

<bundles_post_ra>
// kernel: tpu_custom_call.1
= control target key start
LH: loop header
LB: loop body
LE: loop exit
PB: predicated region body
PF: predicated region fallthrough
CT: control target
= control target key end

     0   :  { %8 = vsyncpa [#allocation4], 0  ;;  %s1059_s0 = inlined_call_operand.hbm [shape: f32[2,8,32], index: 0, kind: input, shape index: {}]   ;;  %s1060_s1 = inlined_call_operand.hbm [shape: f32[3,32,64], index: 1, kind: input, shape index: {}]   ;;  %s1061_s2 = inlined_call_operand.vmem [shape: f32[1,64], index: 2, kind: input, shape index: {}]   ;;  %s1062_s3 = inlined_call_operand.hbm [shape: f32[2,8,32], index: 3, kind: output, shape index: {}]  }
   0x1   :  { %10 = vsyncpa [#allocation4 + $0x1], 0 }
   0x2   :  { %11 = vsyncpa [#allocation7], 0 }
   0x3   :  { %12 = vsyncpa [#allocation5], 0 }
   0x4   :  { %14 = vsyncpa [#allocation5 + $0x1], 0  ;;  %s835_s12 = smov 0   ;;  %s837_s13 = smov 0  }
   0x5   :  { %s839_s14 = smov 0   ;;  %s841_s15 = smov 0  }
   0x6   :  { %s843_s16 = smov 0   ;;  %s845_s17 = smov 0  }
   0x7 LB: > { %s496_s18 = sadd.s32 4294967295, %s802_s17   ;;  %s497_s19 = sadd.s32 4294967294, %s802_s17   ;;  %s802_s17 = sphi %s845_s17, %s20_s17   ;;  %s798_s16 = sphi %s843_s16, %s1086_s16   ;;  %s794_s15 = sphi %s841_s15, %s1085_s15   ;;  %s790_s14 = sphi %s839_s14, %s1084_s14   ;;  %s786_s13 = sphi %s837_s13, %s1083_s13   ;;  %s782_s12 = sphi %s835_s12, %s1082_s12  }
   0x8   : > { %p61_p0 = scmp.ne.s32.totalorder %s786_s13, %s782_s12  ;;  %p869_p1 = scmp.eq.s32.totalorder %s496_s18, 0 }
   0x9   : > { %p873_p2 = scmp.eq.s32.totalorder %s496_s18, 1  ;;  %p147_p3 = scmp.eq.s32.totalorder %s497_s19, 1 }
   0xa   : > { %s1067_s20 = scalar_select %p869_p1, 1, 0 }
   0xb   : > { %s1068_s21 = scalar_select %p873_p2, 1, 0 }
   0xc   : > { %p879_p4 = por %p869_p1, %p61_p0  ;;  %p498_p5 = scmp.ge.s32.totalorder %s802_s17, 1 }
   0xd   : > { %p884_p6 = por %p147_p3, %p61_p0  ;;  %p154_p7 = scmp.lt.s32.totalorder %s802_s17, 3 }
   0xe   : > { %s1069_s22 = scalar_select %p879_p4, 1, 0 }
   0xf   : > { %s1070_s23 = scalar_select %p884_p6, 1, 0 }
  0x10   : > { %p889_p8 = pnand %p498_p5, %p154_p7  ;;  %s804_s25 = smov [#allocation6]  }
  0x11   : > { %s168_s26 = sshll.u32 %s804_s25, 4  ;;  %s35_s28 = sadd.s32 1, %s798_s16  ;;  %s169_s26 = int_to_ptr.vmem [resolvable:$true] %s168_s26 }
  0x12   : > { %s1071_s24 = scalar_select %p889_p8, 1, 0 }
  0x13   : > { %p581_p9 = pneg %p889_p8  ;;  %s658_s4 = scalar_lea.hbm %s1060_s1, 1536 }
  0x14   : > { %p659_p12 = scmp.ne.s32.totalorder %s1060_s1, %s658_s4  ;;  %p665_p5 = scmp.lt.u32.totalorder %s658_s4, %s1060_s1 }
  0x15   : > { %p898_p11 = pnand %p581_p9, %p869_p1 }
  0x17   : > { %p660_p13 = pneg %p898_p11 }
  0x19   : > { %p661_p0 = pnand %p660_p13, %p659_p12 }
  0x1b   : > { %p662_p3 = pneg %p661_p0 }
  0x1d   : > { %p667_p7 = pnand %p665_p5, %p662_p3 }
  0x1f   : > { %670 = shalt.err (!%p667_p7)
}
  0x20   : > { %s671_s9 = scalar_lea.vmem %s169_s26, 1536  ;;  %p679_p1 = scmp.lt.s32.totalorder %s169_s26, %s169_s26 }
  0x21   : > { %p672_p9 = scmp.ne.s32.totalorder %s169_s26, %s671_s9  ;;  %p680_p4 = scmp.lt.s32.totalorder %s671_s9, %s671_s9 }
  0x23   : > { %p674_p10 = pnand %p672_p9, %p660_p13  ;;  %p681_p8 = por %p680_p4, %p679_p1 }
  0x25   : > { %p675_p6 = pneg %p674_p10 }
  0x27   : > { %p682_p2 = pnand %p681_p8, %p675_p6 }
  0x29   : > { %685 = shalt.err (!%p682_p2)
}
  0x2a   : > { %s805_s10 = smov 128   ;;  %s806_s11 = smov 8  }
  0x2b   : > { %584 = dma.hbm_to_vmem [thread:$0]  (!%p898_p11), %s1060_s1, 1536, %s169_s26, [#allocation7], %s805_s10, %s805_s10, %s806_s11  }
  0x2c   : > { %p37_p1 = scmp.ge.s32.totalorder %s35_s28, 2  ;;  %s48_s25 = sadd.s32 1, %s790_s14 }
  0x2d   : > { %p55_p2 = scmp.ne.s32.totalorder %s790_s14, %s786_s13  ;;  %p56_p4 = scmp.eq.s32.totalorder %s802_s17, 0 }
  0x2e   : > { %s1088_s28 = smov (%p37_p1, %s35_s28), 0  ;;  %p1074_p8 = scmp.ne.s32.totalorder %s1068_s21, 0 }
  0x2f   : > { %p925_p6 = por %p56_p4, %p55_p2  ;;  %s43_s27 = ssub.s32 %s798_s16, %s1088_s28 }
  0x30   : > { %p931_p10 = por %p1074_p8, %p55_p2  ;;  %p594_p12 = scmp.lt.s32.totalorder %s802_s17, 2 }
  0x31   : > { %p46_p11 = scmp.eq.s32.totalorder %s43_s27, 0  ;;  %s188_s26 = sand.u32 1, %s790_s14  }
  0x32   : > { %s502_s4 = sshll.u32 %s188_s26, 3  ;;  %s503_s6 = sshll.u32 %s798_s16, 7 }
  0x33   : > { %s940_s5 = scalar_select %p46_p11, %s790_s14, %s48_s25  }
  0x34   : > { %s946_s9 = scalar_lea.hbm %s1059_s0, %s503_s6  ;;  %s192_s21 = scalar_lea.vmem [#allocation3], %s502_s4 }
  0x35   : > { %s200_s10 = sshll.u32 %s192_s21, 4  ;;  %p952_p13 = pnand %p594_p12, %p925_p6  ;;  %s948_s10 = int_to_ptr.vmem [resolvable:$true] %s200_s10 }
  0x36   : > { %s189_s18 = scalar_lea.sflag [#allocation4], %s188_s26  ;;  %s686_s19 = scalar_lea.hbm %s946_s9, 128 }
  0x37   : > { %p687_p0 = scmp.ne.s32.totalorder %s946_s9, %s686_s19  ;;  %p688_p3 = pneg %p952_p13 }
  0x38   : > { %s691_s4 = scalar_lea.hbm %s1059_s0, 256  ;;  %p692_p9 = scmp.lt.u32.totalorder %s946_s9, %s1059_s0 }
  0x39   : > { %p689_p5 = pnand %p688_p3, %p687_p0  ;;  %p693_p1 = scmp.lt.u32.totalorder %s691_s4, %s686_s19 }
  0x3a   : > { %p695_p4 = scmp.lt.u32.totalorder %s686_s19, %s946_s9 }
  0x3b   : > { %p690_p7 = pneg %p689_p5  ;;  %p694_p2 = por %p693_p1, %p692_p9 }
  0x3d   : > { %p696_p6 = por %p695_p4, %p694_p2 }
  0x3f   : > { %p697_p8 = pnand %p696_p6, %p690_p7 }
  0x41   : > { %700 = shalt.err (!%p697_p8)
}
  0x42   : > { %s701_s26 = scalar_lea.vmem %s948_s10, 128  ;;  %s807_s7 = smov [#allocation3]  }
  0x43   : > { %p702_p12 = scmp.ne.s32.totalorder %s948_s10, %s701_s26  ;;  %s706_s8 = sshll.u32 %s807_s7, 4  ;;  %s707_s8 = int_to_ptr.vmem [resolvable:$false] %s706_s8 }
  0x44   : > { %s708_s21 = scalar_lea.vmem %s707_s8, 256  ;;  %p709_p5 = scmp.lt.s32.totalorder %s948_s10, %s707_s8 }
  0x45   : > { %p704_p11 = pnand %p702_p12, %p688_p3  ;;  %p710_p9 = scmp.lt.s32.totalorder %s708_s21, %s701_s26 }
  0x47   : > { %p705_p0 = pneg %p704_p11  ;;  %p711_p1 = por %p710_p9, %p709_p5 }
  0x49   : > { %p712_p2 = pnand %p711_p1, %p705_p0 }
  0x4b   : > { %715 = shalt.err (!%p712_p2)
}
  0x4c   : > { %588 = dma.hbm_to_vmem [thread:$0]  (!%p952_p13), %s946_s9, 128, %s948_s10, %s189_s18  }
  0x4d   : > { %p1077_p7 = scmp.ne.s32.totalorder %s1071_s24, 0 }
  0x4e   : > { %s984_s19 = sand.u32 (!%p1077_p7), 1, %s786_s13   ;;  %p1078_p3 = scmp.ne.s32.totalorder (!%p1077_p7), %s1069_s22, 0 }
  0x4f   : > { %209 = sbr.rel (%p1077_p7) target bundleno = 587 (0x24b), region = 32  ;;  %s505_s25 = sshll.u32 (!%p1077_p7), %s984_s19, 3 }
  0x50   : > { %s212_s27 = scalar_lea.sflag (!%p1077_p7), [#allocation4], %s984_s19  ;;  %s215_s4 = scalar_lea.vmem (!%p1077_p7), [#allocation3], %s505_s25 }
  0x56   : > { %769 = dma.done.wait (%p1078_p3), %s212_s27, 128  }
  0x57   : > { %771 = vsyncadd (%p1078_p3), %s212_s27, 4294967168  ;;  %p1079_p13 = scmp.ne.s32.totalorder %s1067_s20, 0 }
  0x59   : > { %773 = dma.done.wait (%p1079_p13), [#allocation7], 1536  }
  0x5a   : > { %775 = vsyncadd (%p1079_p13), [#allocation7], 4294965760  ;;  %vm251_vm0 = vcmask 253952   ;;  %v808_v0 = vmov 0.0   ;;  %v809_v1 = vmov 0.0|0.0   ;;  %vm810_vm1 = vmmov 0  }
  0x5b   : > { %253 = vst.msk [vmem:[#allocation2 + $0x10] sm:$0x1] %vm251_vm0, %v808_v0  ;;  %252 = vst.msk [vmem:[#allocation2 + $0x7] sm:$0x1] %vm251_vm0, %v808_v0  ;;  %555 = vmatprep.subr.bf16.mxu0 %v809_v1  ;;  %552 = vmatprep.mubr.msk.f32.mxu0 %vm810_vm1, %v808_v0  ;;  %vm249_vm2 = vcmask 261120   ;;  %v248_v2 = vld [vmem:[%s215_s4] sm:$0xff] }
  0x5c   : > { %v267_v3 = vld [vmem:[#allocation6] sm:$0xff]  ;;  %v268_v4 = vld [vmem:[#allocation6 + $0x8] sm:$0xff]  ;;  %s811_s22 = smov 32   ;;  %250 = vst.msk [vmem:[#allocation2 + $0x8] sm:$0xff] %vm249_vm2, %v248_v2  ;;  %v269_v6 = vld [vmem:[#allocation6 + $0x10] sm:$0xff]  ;;  %s812_s20 = smov 64  }
  0x5d   : > { %257 = vrot.lane.b32.xlu0 %v248_v2, %s811_s22  ;;  %v556_v5 = vpack.c.bf16 %v268_v4, %v267_v3  ;;  %v270_v7 = vld [vmem:[#allocation6 + $0x18] sm:$0xff]  ;;  %v271_v9 = vld [vmem:[#allocation6 + $0x20] sm:$0xff]  ;;  %v272_v10 = vld [vmem:[#allocation6 + $0x28] sm:$0xff]  ;;  %vm265_vm3 = vcmask 523264   ;;  %vm286_vm4 = vcmask 785408   ;;  %s813_s10 = smov 96  }
  0x5e   : > { %v559_v8 = vpack.c.bf16 %v270_v7, %v269_v6  ;;  %v562_v11 = vpack.c.bf16 %v272_v10, %v271_v9  ;;  %v273_v13 = vld [vmem:[#allocation6 + $0x30] sm:$0xff]  ;;  %v274_v14 = vld [vmem:[#allocation6 + $0x38] sm:$0xff]  ;;  %v275_v16 = vld [vmem:[#allocation6 + $0x40] sm:$0xff]  ;;  %s512_s11 = sshll.u32 %s794_s15, 7  ;;  %s244_s18 = scalar_lea.vmem [#allocation8], %s505_s25 }
  0x5f   : > { %557 = vmatpush3.bf16.msra.mxu0 %v556_v5  ;;  %v565_v15 = vpack.c.bf16 %v274_v14, %v273_v13  ;;  %v276_v17 = vld [vmem:[#allocation6 + $0x48] sm:$0xff]  ;;  %v277_v19 = vld [vmem:[#allocation6 + $0x50] sm:$0xff]  ;;  %v278_v20 = vld [vmem:[#allocation6 + $0x58] sm:$0xff]  ;;  %s388_s29 = sshll.u32 %s244_s18, 4  ;;  %s1009_s7 = scalar_lea.hbm %s1062_s3, %s512_s11  ;;  %s1011_s29 = int_to_ptr.vmem [resolvable:$true] %s388_s29 }
  0x60   : > { %558 = vmatprep.subr.bf16.mxu0 %v809_v1  ;;  %v568_v18 = vpack.c.bf16 %v276_v17, %v275_v16  ;;  %v571_v21 = vpack.c.bf16 %v278_v20, %v277_v19  ;;  %v508_v27 = vld [vmem:[%s1061_s2] ss:$0 sm:$0xff]  ;;  %s373_s8 = scalar_lea.sflag [#allocation5], %s984_s19  ;;  %s716_s21 = scalar_lea.vmem %s1011_s29, 128 }
  0x61   : > { %p717_p4 = scmp.ne.s32.totalorder %s1011_s29, %s716_s21  ;;  %s814_s15 = smov [#allocation8]  }
  0x62   : > { %s720_s25 = sshll.u32 %s814_s15, 4  ;;  %s721_s25 = int_to_ptr.vmem [resolvable:$false] %s720_s25 }
  0x63   : > { %560 = vmatpush3.bf16.msra.mxu0 %v559_v8  ;;  %v255_v12 = vld [vmem:[#allocation2 + $0x9] sm:$0xff]  ;;  %p718_p6 = pnand %p717_p4, %p931_p10  ;;  %s722_s27 = scalar_lea.vmem %s721_s25, 256 }
  0x64   : > { %561 = vmatprep.subr.bf16.mxu0 %v809_v1  ;;  %261 = vrot.lane.b32.xlu0 %v255_v12, %s812_s20  ;;  %v254_v23 = vld [vmem:[#allocation2 + $0x7] sm:$0xff]  ;;  %p723_p12 = scmp.lt.s32.totalorder %s1011_s29, %s721_s25  ;;  %p724_p11 = scmp.lt.s32.totalorder %s722_s27, %s716_s21 }
  0x65   : > { %p719_p8 = pneg %p718_p6 }
  0x66   : > { %p725_p0 = por %p724_p11, %p723_p12 }
  0x67   : > { %563 = vmatpush3.bf16.msra.mxu0 %v562_v11 }
  0x68   : > { %564 = vmatprep.subr.bf16.mxu0 %v809_v1  ;;  %p726_p5 = pnand %p725_p0, %p719_p8 }
  0x6b   : > { %566 = vmatpush3.bf16.msra.mxu0 %v565_v15 }
  0x6c   : > { %567 = vmatprep.subr.bf16.mxu0 %v809_v1 }
  0x6f   : > { %569 = vmatpush3.bf16.msra.mxu0 %v568_v18 }
  0x70   : > { %570 = vmatprep.subr.bf16.mxu0 %v809_v1 }
  0x73   : > { %572 = vmatpush3.bf16.msra.mxu0 %v571_v21 }
  0xcf   : > { %v258_v22 = vpop.permute.xlu0 %257 }
  0xd0   : > { %v264_v24 = vsel %vm249_vm2, %v254_v23, %v258_v22 }
  0xd6   : > { %v262_v25 = vpop.permute.xlu0 %261 }
  0xd7   : > { %v266_v26 = vsel %vm265_vm3, %v264_v24, %v262_v25 }
  0xd8   : > { %553 = vmatmul.mubr.msk.f32.vlgmr.msra.gmra.mrb[0].mxu0 %vm286_vm4, %v266_v26 }
 0x1ab   : > { %v356_v28 = vpop.f32.mrb[0].mxu0 }
 0x1ac   : > { %v357_v29 = vadd.f32 %v508_v27, %v356_v28  ;;  %v554_v30 = vpop.f32.mrb[1].mxu0 }
 0x1ae   : > { %v510_v31 = vmul.f32 -1.442695, %v357_v29 }
 0x1b0   : > { %654 = vpow2.f32 %v510_v31 }
 0x1ba   : > { %v655_v32 = vpop.eup %654 }
 0x1bb   : > { %v363_v33 = vadd.f32 1.0, %v655_v32 }
 0x1bd   : > { %656 = vrcp.f32 %v363_v33 }
 0x1c7   : > { %v657_v34 = vpop.eup %656 }
 0x1c8   : > { %367 = vrot.lane.b32.xlu1 %v657_v34, %s813_s10 }
 0x23a   : > { %v368_v35 = vpop.permute.xlu1 %367 }
 0x23b   : > { %v370_v36 = vmul.f32 %v368_v35, %v357_v29 }
 0x23d   : > { %371 = vst.msk [vmem:[%s244_s18] sm:$0xff] %vm249_vm2, %v370_v36 }
 0x23e   : > { %729 = shalt.err (!%p726_p5)
}
 0x23f   : > { %s730_s19 = scalar_lea.hbm %s1009_s7, 128  ;;  %s734_s20 = scalar_lea.hbm %s1062_s3, 256 }
 0x240   : > { %p731_p9 = scmp.ne.s32.totalorder %s1009_s7, %s730_s19  ;;  %p735_p7 = scmp.lt.u32.totalorder %s1009_s7, %s1062_s3 }
 0x241   : > { %p736_p3 = scmp.lt.u32.totalorder %s734_s20, %s730_s19  ;;  %p738_p4 = scmp.lt.u32.totalorder %s730_s19, %s1009_s7 }
 0x242   : > { %p732_p1 = pnand %p731_p9, %p931_p10 }
 0x243   : > { %p737_p13 = por %p736_p3, %p735_p7 }
 0x244   : > { %p733_p2 = pneg %p732_p1 }
 0x245   : > { %p739_p6 = por %p738_p4, %p737_p13 }
 0x247   : > { %p740_p8 = pnand %p739_p6, %p733_p2 }
 0x249   : > { %743 = shalt.err (!%p740_p8)
}
 0x24a   : > { %579 = dma.vmem_to_hbm [thread:$0]  (%p931_p10), %s1011_s29, 128, %s1009_s7, %s373_s8  }
 0x24b PF: > { %s400_s10 = sand.u32 1, %s782_s12   ;;  %p1080_p12 = scmp.ne.s32.totalorder %s1070_s23, 0 }
 0x24c   : > { %p1081_p11 = scmp.ge.s32.totalorder %s802_s17, 2  ;;  %s401_s11 = scalar_lea.sflag [#allocation5], %s400_s10 }
 0x24e   : > { %p590_p0 = pnand %p1081_p11, %p1080_p12 }
 0x250   : > { %777 = dma.done.wait (!%p590_p0), %s401_s11, 128  }
 0x251   : > { %779 = vsyncadd (!%p590_p0), %s401_s11, 4294967168  ;;  %s20_s17 = sadd.s32 1, %s802_s17   ;;  %s1082_s12 = smov %s786_s13 }
 0x252   : > { %p17_p5 = scmp.ge.s32.totalorder %s20_s17, 4   ;;  %s1083_s13 = smov %s790_s14 }
 0x253   : > { %s1084_s14 = smov %s940_s5  ;;  %s1085_s15 = smov %s798_s16 }
 0x254   : > { %s1086_s16 = smov %s1088_s28  ;;  %19 = sbr.rel (!%p17_p5) target bundleno = 7 (0x7), region = 85 }
 0x25b   :  { %406 = vsyncpa [#allocation4], 1 }
 0x25c   :  { %408 = vsyncpa [#allocation4 + $0x1], 1 }
 0x25d   :  { %409 = vsyncpa [#allocation7], 1 }
 0x25e   :  { %410 = vsyncpa [#allocation5], 1 }
 0x25f   :  { %412 = vsyncpa [#allocation5 + $0x1], 1 }

</bundles_post_ra>
